<compile_context>
chip_gen: v6e
topology: v6e:2x2x1
jax: 0.10.0
libtpu: 0.0.40
codegen_flags: <defaults>
</compile_context>

<pallas_src>
import jax
import jax.numpy as jnp
from jax.experimental import pallas as pl
from jax.experimental.pallas import tpu as pltpu


def _mlp_kernel(x_ref,
                w1_ref, b1_ref,
                w2_ref, b2_ref,
                w3_ref, b3_ref,
                w4_ref, b4_ref,
                w5_ref, b5_ref,
                o_ref):
    # Cast the f32 input tile to bf16 in-kernel instead of materializing a
    # bf16 copy of x in HBM via a separate XLA op.
    x = x_ref[...].astype(jnp.bfloat16)

    # 5 chained MXU matmuls (bf16 operands, f32 accumulate) + f32 epilogues.
    h = jnp.dot(x, w1_ref[...], preferred_element_type=jnp.float32)
    h = jnp.maximum(h + b1_ref[...], 0.0)
    # TODO(synk): Dropout(p=0.3) omitted — inference (model.eval()) semantics.
    h = jnp.dot(h.astype(jnp.bfloat16), w2_ref[...],
                preferred_element_type=jnp.float32)
    h = jnp.maximum(h + b2_ref[...], 0.0)
    h = jnp.dot(h.astype(jnp.bfloat16), w3_ref[...],
                preferred_element_type=jnp.float32)
    h = jnp.maximum(h + b3_ref[...], 0.0)
    h = jnp.dot(h.astype(jnp.bfloat16), w4_ref[...],
                preferred_element_type=jnp.float32)
    h = jnp.maximum(h + b4_ref[...], 0.0)
    h = jnp.dot(h.astype(jnp.bfloat16), w5_ref[...],
                preferred_element_type=jnp.float32)
    o_ref[...] = (h + b5_ref[...]).astype(o_ref.dtype)


def _choose_tiling(batch, tb_max):
    """Pick (b_pad, tb): 128-aligned, no over-padding of tiny batches, and a
    >=2-step batch grid whenever the (padded) batch is big enough so both v7x
    TensorCores get work and tile DMAs have a step to pipeline against."""
    b_pad = pl.cdiv(batch, 128) * 128
    if b_pad <= tb_max:
        tb = b_pad // 2 if b_pad >= 256 else b_pad
    else:
        tb = tb_max
        b_pad = pl.cdiv(batch, tb) * tb
    return b_pad, tb


def mlp_forward(x, params, *, tb_max=1024):
    """x: (B, input_dim) f32.  params: list of (W, b) with W:(in,out), b:(1,out)."""
    (w1, b1), (w2, b2), (w3, b3), (w4, b4), (w5, b5) = params
    B, in_dim = x.shape
    out_dim = w5.shape[1]

    # --- wrapper-side layout plumbing -------------------------------------
    b_pad, tb = _choose_tiling(B, tb_max)
    if b_pad != B:
        x = jnp.pad(x, ((0, b_pad - B), (0, 0)))

    # bf16 weights for the MXU; biases stay f32 (f32 epilogue).
    w1b = w1.astype(jnp.bfloat16)
    w2b = w2.astype(jnp.bfloat16)
    w3b = w3.astype(jnp.bfloat16)
    w4b = w4.astype(jnp.bfloat16)
    w5b = w5.astype(jnp.bfloat16)

    grid = (b_pad // tb,)

    # Weights/biases: whole array as one block with a constant block index, so
    # they are DMA'd once and stay resident in VMEM across the batch grid.
    def resident(a):
        return pl.BlockSpec(a.shape, lambda i: (0, 0))

    dims = (in_dim, 128, 64, 32, 16, out_dim)
    flops = 2 * b_pad * sum(dims[i] * dims[i + 1] for i in range(5))
    weight_bytes = sum(int(a.size) * a.dtype.itemsize
                       for a in (w1b, w2b, w3b, w4b, w5b, b1, b2, b3, b4, b5))
    bytes_accessed = b_pad * in_dim * 4 + b_pad * out_dim * 4 + weight_bytes

    out = pl.pallas_call(
        _mlp_kernel,
        out_shape=jax.ShapeDtypeStruct((b_pad, out_dim), jnp.float32),
        grid=grid,
        in_specs=[pl.BlockSpec((tb, in_dim), lambda i: (i, 0)),
                  resident(w1b), resident(b1),
                  resident(w2b), resident(b2),
                  resident(w3b), resident(b3),
                  resident(w4b), resident(b4),
                  resident(w5b), resident(b5)],
        out_specs=pl.BlockSpec((tb, out_dim), lambda i: (i, 0)),
        compiler_params=pltpu.CompilerParams(
            dimension_semantics=("parallel",)),
        cost_estimate=pl.CostEstimate(flops=flops, transcendentals=0,
                                      bytes_accessed=bytes_accessed),
    )(x, w1b, b1, w2b, b2, w3b, b3, w4b, b4, w5b, b5)

    # Strip batch padding (output is already narrow: out_dim columns).
    return out[:B]


def init_params(key, input_dim, output_dim):
    """Deterministic init mimicking PyTorch Linear: U(-1/sqrt(fan_in), +1/sqrt(fan_in))."""
    dims = [input_dim, 128, 64, 32, 16, output_dim]
    params = []
    for i in range(5):
        fan_in, fan_out = dims[i], dims[i + 1]
        key, kw, kb = jax.random.split(key, 3)
        bound = 1.0 / jnp.sqrt(jnp.float32(fan_in))
        w = jax.random.uniform(kw, (fan_in, fan_out), jnp.float32, -bound, bound)
        b = jax.random.uniform(kb, (1, fan_out), jnp.float32, -bound, bound)
        params.append((w, b))
    return params


def reference_forward(x, params):
    """Pure-JAX reference with the same bf16-operand / f32-accumulate math."""
    h = x
    n = len(params)
    for i, (w, b) in enumerate(params):
        h = jnp.dot(h.astype(jnp.bfloat16), w.astype(jnp.bfloat16),
                    preferred_element_type=jnp.float32) + b
        if i < n - 1:
            h = jnp.maximum(h, 0.0)
    return h


if __name__ == "__main__":
    key = jax.random.PRNGKey(0)
    input_dim = 12   # wine dataset feature count (train.csv minus 'quality')
    output_dim = 7   # wine quality classes

    kx1, kx2, kp = jax.random.split(key, 3)
    params = init_params(kp, input_dim, output_dim)

    # Small batch (exercises the no-over-padding / single-step path).
    x_small = jax.random.normal(kx1, (8, input_dim), jnp.float32)
    out_small = jax.block_until_ready(mlp_forward(x_small, params))
    ref_small = reference_forward(x_small, params)
    assert out_small.shape == (8, output_dim)
    assert jnp.allclose(out_small, ref_small, atol=5e-3, rtol=5e-3), \
        "small-batch mismatch vs reference"

    # Larger batch (exercises the multi-step, pipelined / dual-core grid path).
    x_big = jax.random.normal(kx2, (400, input_dim), jnp.float32)
    out_big = jax.block_until_ready(mlp_forward(x_big, params))
    ref_big = reference_forward(x_big, params)
    assert out_big.shape == (400, output_dim)
    assert jnp.allclose(out_big, ref_big, atol=5e-3, rtol=5e-3), \
        "large-batch mismatch vs reference"

    print("KERNEL_OK")
</pallas_src>

<mosaic_0001>
module attributes {stable_mosaic.version = 11 : i64} {
  func.func @_mlp_kernel(%arg0: i32, %arg1: memref<128x12xf32, #tpu.memory_space<vmem>>, %arg2: memref<12x128xbf16, #tpu.memory_space<vmem>>, %arg3: memref<1x128xf32, #tpu.memory_space<vmem>>, %arg4: memref<128x64xbf16, #tpu.memory_space<vmem>>, %arg5: memref<1x64xf32, #tpu.memory_space<vmem>>, %arg6: memref<64x32xbf16, #tpu.memory_space<vmem>>, %arg7: memref<1x32xf32, #tpu.memory_space<vmem>>, %arg8: memref<32x16xbf16, #tpu.memory_space<vmem>>, %arg9: memref<1x16xf32, #tpu.memory_space<vmem>>, %arg10: memref<16x7xbf16, #tpu.memory_space<vmem>>, %arg11: memref<1x7xf32, #tpu.memory_space<vmem>>, %arg12: memref<128x7xf32, #tpu.memory_space<vmem>>) attributes {dimension_semantics = [#tpu.dimension_semantics<parallel>], iteration_bounds = array<i64: 1>, scalar_prefetch = 0 : i64, scratch_operands = 0 : i64, tpu.core_type = #tpu.core_type<tc>, window_params = [{transform_indices = @transform_0, window_bounds = array<i64: 128, 12>}, {pipeline_mode = #tpu.pipeline_mode<synchronous>, transform_indices = @transform_1, window_bounds = array<i64: 12, 128>}, {pipeline_mode = #tpu.pipeline_mode<synchronous>, transform_indices = @transform_2, window_bounds = array<i64: 1, 128>}, {pipeline_mode = #tpu.pipeline_mode<synchronous>, transform_indices = @transform_3, window_bounds = array<i64: 128, 64>}, {pipeline_mode = #tpu.pipeline_mode<synchronous>, transform_indices = @transform_4, window_bounds = array<i64: 1, 64>}, {pipeline_mode = #tpu.pipeline_mode<synchronous>, transform_indices = @transform_5, window_bounds = array<i64: 64, 32>}, {pipeline_mode = #tpu.pipeline_mode<synchronous>, transform_indices = @transform_6, window_bounds = array<i64: 1, 32>}, {pipeline_mode = #tpu.pipeline_mode<synchronous>, transform_indices = @transform_7, window_bounds = array<i64: 32, 16>}, {pipeline_mode = #tpu.pipeline_mode<synchronous>, transform_indices = @transform_8, window_bounds = array<i64: 1, 16>}, {pipeline_mode = #tpu.pipeline_mode<synchronous>, transform_indices = @transform_9, window_bounds = array<i64: 16, 7>}, {pipeline_mode = #tpu.pipeline_mode<synchronous>, transform_indices = @transform_10, window_bounds = array<i64: 1, 7>}, {transform_indices = @transform_11, window_bounds = array<i64: 128, 7>}]} {
    %c0 = arith.constant 0 : index
    %c0_0 = arith.constant 0 : index
    %0 = vector.load %arg1[%c0, %c0_0] : memref<128x12xf32, #tpu.memory_space<vmem>>, vector<128x12xf32>
    %1 = arith.truncf %0 : vector<128x12xf32> to vector<128x12xbf16>
    %c0_1 = arith.constant 0 : index
    %c0_2 = arith.constant 0 : index
    %2 = vector.load %arg2[%c0_1, %c0_2] : memref<12x128xbf16, #tpu.memory_space<vmem>>, vector<12x128xbf16>
    %cst = arith.constant dense<0.000000e+00> : vector<128x128xf32>
    %3 = tpu.matmul %1, %2, %cst {dimension_numbers = #tpu.dot_dimension_numbers<[1], [0], [0], [1], [0, 0, 1, 1], [], []>} : vector<128x12xbf16>, vector<12x128xbf16>, vector<128x128xf32> -> vector<128x128xf32>
    %c0_3 = arith.constant 0 : index
    %c0_4 = arith.constant 0 : index
    %4 = vector.load %arg3[%c0_3, %c0_4] : memref<1x128xf32, #tpu.memory_space<vmem>>, vector<1x128xf32>
    %5 = vector.broadcast %4 : vector<1x128xf32> to vector<128x128xf32>
    %6 = arith.addf %3, %5 : vector<128x128xf32>
    %cst_5 = arith.constant 0.000000e+00 : f32
    %7 = vector.broadcast %cst_5 : f32 to vector<128x128xf32>
    %8 = arith.maximumf %6, %7 : vector<128x128xf32>
    %9 = arith.truncf %8 : vector<128x128xf32> to vector<128x128xbf16>
    %c0_6 = arith.constant 0 : index
    %c0_7 = arith.constant 0 : index
    %10 = vector.load %arg4[%c0_6, %c0_7] : memref<128x64xbf16, #tpu.memory_space<vmem>>, vector<128x64xbf16>
    %cst_8 = arith.constant dense<0.000000e+00> : vector<128x64xf32>
    %11 = tpu.matmul %9, %10, %cst_8 {dimension_numbers = #tpu.dot_dimension_numbers<[1], [0], [0], [1], [0, 0, 1, 1], [], []>} : vector<128x128xbf16>, vector<128x64xbf16>, vector<128x64xf32> -> vector<128x64xf32>
    %c0_9 = arith.constant 0 : index
    %c0_10 = arith.constant 0 : index
    %12 = vector.load %arg5[%c0_9, %c0_10] : memref<1x64xf32, #tpu.memory_space<vmem>>, vector<1x64xf32>
    %13 = vector.broadcast %12 : vector<1x64xf32> to vector<128x64xf32>
    %14 = arith.addf %11, %13 : vector<128x64xf32>
    %cst_11 = arith.constant 0.000000e+00 : f32
    %15 = vector.broadcast %cst_11 : f32 to vector<128x64xf32>
    %16 = arith.maximumf %14, %15 : vector<128x64xf32>
    %17 = arith.truncf %16 : vector<128x64xf32> to vector<128x64xbf16>
    %c0_12 = arith.constant 0 : index
    %c0_13 = arith.constant 0 : index
    %18 = vector.load %arg6[%c0_12, %c0_13] : memref<64x32xbf16, #tpu.memory_space<vmem>>, vector<64x32xbf16>
    %cst_14 = arith.constant dense<0.000000e+00> : vector<128x32xf32>
    %19 = tpu.matmul %17, %18, %cst_14 {dimension_numbers = #tpu.dot_dimension_numbers<[1], [0], [0], [1], [0, 0, 1, 1], [], []>} : vector<128x64xbf16>, vector<64x32xbf16>, vector<128x32xf32> -> vector<128x32xf32>
    %c0_15 = arith.constant 0 : index
    %c0_16 = arith.constant 0 : index
    %20 = vector.load %arg7[%c0_15, %c0_16] : memref<1x32xf32, #tpu.memory_space<vmem>>, vector<1x32xf32>
    %21 = vector.broadcast %20 : vector<1x32xf32> to vector<128x32xf32>
    %22 = arith.addf %19, %21 : vector<128x32xf32>
    %cst_17 = arith.constant 0.000000e+00 : f32
    %23 = vector.broadcast %cst_17 : f32 to vector<128x32xf32>
    %24 = arith.maximumf %22, %23 : vector<128x32xf32>
    %25 = arith.truncf %24 : vector<128x32xf32> to vector<128x32xbf16>
    %c0_18 = arith.constant 0 : index
    %c0_19 = arith.constant 0 : index
    %26 = vector.load %arg8[%c0_18, %c0_19] : memref<32x16xbf16, #tpu.memory_space<vmem>>, vector<32x16xbf16>
    %cst_20 = arith.constant dense<0.000000e+00> : vector<128x16xf32>
    %27 = tpu.matmul %25, %26, %cst_20 {dimension_numbers = #tpu.dot_dimension_numbers<[1], [0], [0], [1], [0, 0, 1, 1], [], []>} : vector<128x32xbf16>, vector<32x16xbf16>, vector<128x16xf32> -> vector<128x16xf32>
    %c0_21 = arith.constant 0 : index
    %c0_22 = arith.constant 0 : index
    %28 = vector.load %arg9[%c0_21, %c0_22] : memref<1x16xf32, #tpu.memory_space<vmem>>, vector<1x16xf32>
    %29 = vector.broadcast %28 : vector<1x16xf32> to vector<128x16xf32>
    %30 = arith.addf %27, %29 : vector<128x16xf32>
    %cst_23 = arith.constant 0.000000e+00 : f32
    %31 = vector.broadcast %cst_23 : f32 to vector<128x16xf32>
    %32 = arith.maximumf %30, %31 : vector<128x16xf32>
    %33 = arith.truncf %32 : vector<128x16xf32> to vector<128x16xbf16>
    %c0_24 = arith.constant 0 : index
    %c0_25 = arith.constant 0 : index
    %34 = vector.load %arg10[%c0_24, %c0_25] : memref<16x7xbf16, #tpu.memory_space<vmem>>, vector<16x7xbf16>
    %cst_26 = arith.constant dense<0.000000e+00> : vector<128x7xf32>
    %35 = tpu.matmul %33, %34, %cst_26 {dimension_numbers = #tpu.dot_dimension_numbers<[1], [0], [0], [1], [0, 0, 1, 1], [], []>} : vector<128x16xbf16>, vector<16x7xbf16>, vector<128x7xf32> -> vector<128x7xf32>
    %c0_27 = arith.constant 0 : index
    %c0_28 = arith.constant 0 : index
    %36 = vector.load %arg11[%c0_27, %c0_28] : memref<1x7xf32, #tpu.memory_space<vmem>>, vector<1x7xf32>
    %37 = vector.broadcast %36 : vector<1x7xf32> to vector<128x7xf32>
    %38 = arith.addf %35, %37 : vector<128x7xf32>
    %c0_29 = arith.constant 0 : index
    %c0_30 = arith.constant 0 : index
    %39 = vector.load %arg12[%c0_29, %c0_30] : memref<128x7xf32, #tpu.memory_space<vmem>>, vector<128x7xf32>
    tpu.vector_store %arg12[%c0_29, %c0_30], %38 {strides = array<i32>} : memref<128x7xf32, #tpu.memory_space<vmem>>, vector<128x7xf32>,
    return
  }
  func.func @transform_0(%arg0: i32) -> (i32, i32) {
    %c0_i32 = arith.constant 0 : i32
    %c0_i32_0 = arith.constant 0 : i32
    return %arg0, %c0_i32 : i32, i32
  }
  func.func @transform_1(%arg0: i32) -> (i32, i32) {
    %c0_i32 = arith.constant 0 : i32
    %c0_i32_0 = arith.constant 0 : i32
    %c0_i32_1 = arith.constant 0 : i32
    return %c0_i32, %c0_i32_0 : i32, i32
  }
  func.func @transform_2(%arg0: i32) -> (i32, i32) {
    %c0_i32 = arith.constant 0 : i32
    %c0_i32_0 = arith.constant 0 : i32
    %c0_i32_1 = arith.constant 0 : i32
    return %c0_i32, %c0_i32_0 : i32, i32
  }
  func.func @transform_3(%arg0: i32) -> (i32, i32) {
    %c0_i32 = arith.constant 0 : i32
    %c0_i32_0 = arith.constant 0 : i32
    %c0_i32_1 = arith.constant 0 : i32
    return %c0_i32, %c0_i32_0 : i32, i32
  }
  func.func @transform_4(%arg0: i32) -> (i32, i32) {
    %c0_i32 = arith.constant 0 : i32
    %c0_i32_0 = arith.constant 0 : i32
    %c0_i32_1 = arith.constant 0 : i32
    return %c0_i32, %c0_i32_0 : i32, i32
  }
  func.func @transform_5(%arg0: i32) -> (i32, i32) {
    %c0_i32 = arith.constant 0 : i32
    %c0_i32_0 = arith.constant 0 : i32
    %c0_i32_1 = arith.constant 0 : i32
    return %c0_i32, %c0_i32_0 : i32, i32
  }
  func.func @transform_6(%arg0: i32) -> (i32, i32) {
    %c0_i32 = arith.constant 0 : i32
    %c0_i32_0 = arith.constant 0 : i32
    %c0_i32_1 = arith.constant 0 : i32
    return %c0_i32, %c0_i32_0 : i32, i32
  }
  func.func @transform_7(%arg0: i32) -> (i32, i32) {
    %c0_i32 = arith.constant 0 : i32
    %c0_i32_0 = arith.constant 0 : i32
    %c0_i32_1 = arith.constant 0 : i32
    return %c0_i32, %c0_i32_0 : i32, i32
  }
  func.func @transform_8(%arg0: i32) -> (i32, i32) {
    %c0_i32 = arith.constant 0 : i32
    %c0_i32_0 = arith.constant 0 : i32
    %c0_i32_1 = arith.constant 0 : i32
    return %c0_i32, %c0_i32_0 : i32, i32
  }
  func.func @transform_9(%arg0: i32) -> (i32, i32) {
    %c0_i32 = arith.constant 0 : i32
    %c0_i32_0 = arith.constant 0 : i32
    %c0_i32_1 = arith.constant 0 : i32
    return %c0_i32, %c0_i32_0 : i32, i32
  }
  func.func @transform_10(%arg0: i32) -> (i32, i32) {
    %c0_i32 = arith.constant 0 : i32
    %c0_i32_0 = arith.constant 0 : i32
    %c0_i32_1 = arith.constant 0 : i32
    return %c0_i32, %c0_i32_0 : i32, i32
  }
  func.func @transform_11(%arg0: i32) -> (i32, i32) {
    %c0_i32 = arith.constant 0 : i32
    %c0_i32_0 = arith.constant 0 : i32
    return %arg0, %c0_i32 : i32, i32
  }
}

</mosaic_0001>

<bundles_post_ra>
// kernel: tpu_custom_call.1
= control target key start
LH: loop header
LB: loop body
LE: loop exit
PB: predicated region body
PF: predicated region fallthrough
CT: control target
= control target key end

     0   :  { %vm102_vm0 = vcmask 1045504   ;;  %vm77_vm1 = vcmask 97280   ;;  %vm458_vm2 = vcmask 523264   ;;  %vm627_vm3 = vcmask 261120   ;;  %s1436_s1 = inlined_call_operand.vmem [shape: bf16[12,128], index: 1, kind: input, shape index: {}]   ;;  %s1437_s0 = inlined_call_operand.vmem [shape: f32[128,12], index: 0, kind: input, shape index: {}]   ;;  %s1438_s3 = inlined_call_operand.vmem [shape: bf16[128,64], index: 3, kind: input, shape index: {}]   ;;  %s1439_s5 = inlined_call_operand.vmem [shape: bf16[64,32], index: 5, kind: input, shape index: {}]   ;;  %s1440_s2 = inlined_call_operand.vmem [shape: f32[1,128], index: 2, kind: input, shape index: {}]   ;;  %s1441_s7 = inlined_call_operand.vmem [shape: bf16[32,16], index: 7, kind: input, shape index: {}]   ;;  %s1442_s4 = inlined_call_operand.vmem [shape: f32[1,64], index: 4, kind: input, shape index: {}]   ;;  %s1443_s9 = inlined_call_operand.vmem [shape: bf16[16,7], index: 9, kind: input, shape index: {}]   ;;  %s1444_s6 = inlined_call_operand.vmem [shape: f32[1,32], index: 6, kind: input, shape index: {}]   ;;  %s1445_s8 = inlined_call_operand.vmem [shape: f32[1,16], index: 8, kind: input, shape index: {}]   ;;  %s1446_s10 = inlined_call_operand.vmem [shape: f32[1,7], index: 10, kind: input, shape index: {}]   ;;  %s1447_s11 = inlined_call_operand.vmem [shape: f32[128,7], index: 11, kind: output, shape index: {}]  }
   0x1   :  { %v1153_v0 = vld [vmem:[%s1436_s1] sm:$0x3f]   ;;  %v40_v2 = vld [vmem:[%s1437_s0 + $0x8] sm:$0xff]  ;;  %v41_v3 = vld [vmem:[%s1437_s0 + $0x10] sm:$0xff]  ;;  %vm788_vm4 = vcmask 130048   ;;  %vm910_vm5 = vcmask 56320  }
   0x2   :  { %v39_v1 = vld [vmem:[%s1437_s0] sm:$0xff]  ;;  %1152 = vmatprep.subr.msk.bf16.mxu0 %vm102_vm0, %v1153_v0  ;;  %v104_v4 = vsel %vm102_vm0, %v1153_v0, 0  ;;  %v42_v6 = vld [vmem:[%s1437_s0 + $0x18] sm:$0xff]  ;;  %v44_v8 = vld [vmem:[%s1437_s0 + $0x28] sm:$0xff] }
   0x3   :  { %v55_v5 = vpack.c.bf16 %v40_v2, %v39_v1  ;;  %v43_v7 = vld [vmem:[%s1437_s0 + $0x20] sm:$0xff]  ;;  %1041 = vmatpush3.bf16.msra.mxu0 %v104_v4  ;;  %v56_v9 = vpack.c.bf16 %v42_v6, %v41_v3  ;;  %v45_v11 = vld [vmem:[%s1437_s0 + $0x30] sm:$0xff]  ;;  %v46_v12 = vld [vmem:[%s1437_s0 + $0x38] sm:$0xff] }
   0x4   :  { %v57_v10 = vpack.c.bf16 %v44_v8, %v43_v7  ;;  %v47_v13 = vld [vmem:[%s1437_s0 + $0x40] sm:$0xff]  ;;  %v48_v14 = vld [vmem:[%s1437_s0 + $0x48] sm:$0xff]  ;;  %v1154_v15 = vld [vmem:[%s1438_s3 + $0x38] sm:$0xff]   ;;  %v58_v17 = vpack.c.bf16 %v46_v12, %v45_v11 }
   0x5   :  { %1042 = vmatprep.mubr.msk.bf16.mxu0 %vm77_vm1, %v55_v5  ;;  %v1155_v16 = vld [vmem:[%s1438_s3 + $0x30] sm:$0xff]   ;;  %1058 = vmatprep.subr.bf16.mxu1 %v1154_v15  ;;  %v59_v18 = vpack.c.bf16 %v48_v14, %v47_v13  ;;  %v1156_v19 = vld [vmem:[%s1438_s3 + $0x28] sm:$0xff]   ;;  %v50_v21 = vld [vmem:[%s1437_s0 + $0x58] sm:$0xff] }
   0x6   :  { %1043 = vmatmul.mubr.msk.bf16.vlgmr.msra.gmra.mxu0 %vm77_vm1, %v56_v9  ;;  %1059 = vmatpush3.bf16.msra.mxu1 %v1154_v15  ;;  %v49_v20 = vld [vmem:[%s1437_s0 + $0x50] sm:$0xff]  ;;  %v1157_v22 = vld [vmem:[%s1438_s3 + $0x20] sm:$0xff]   ;;  %v52_v24 = vld [vmem:[%s1437_s0 + $0x68] sm:$0xff] }
   0x7   :  { %1046 = vmatprep.mubr.msk.bf16.mxu0 %vm77_vm1, %v57_v10  ;;  %1060 = vmatprep.subr.bf16.mxu1 %v1155_v16  ;;  %v51_v23 = vld [vmem:[%s1437_s0 + $0x60] sm:$0xff]  ;;  %v60_v25 = vpack.c.bf16 %v50_v21, %v49_v20  ;;  %v1158_v27 = vld [vmem:[%s1438_s3 + $0x18] sm:$0xff]   ;;  %v53_v28 = vld [vmem:[%s1437_s0 + $0x70] sm:$0xff] }
   0x8   :  { %v61_v26 = vpack.c.bf16 %v52_v24, %v51_v23  ;;  %v54_v29 = vld [vmem:[%s1437_s0 + $0x78] sm:$0xff]  ;;  %v1159_v31 = vld [vmem:[%s1438_s3 + $0x10] sm:$0xff]   ;;  %v1160_v32 = vld [vmem:[%s1438_s3 + $0x8] sm:$0xff]  }
   0x9   :  { %v62_v30 = vpack.c.bf16 %v54_v29, %v53_v28  ;;  %v1161_v33 = vld [vmem:[%s1438_s3] sm:$0xff]   ;;  %v1162_v34 = vld [vmem:[%s1439_s5 + $0x18] sm:$0xff]   ;;  %v1163_v35 = vld [vmem:[%s1439_s5 + $0x10] sm:$0xff]  }
   0xa   :  { %1061 = vmatpush3.bf16.msra.mxu1 %v1155_v16  ;;  %1090 = vmatprep.subr.bf16.mxu0 %v1162_v34  ;;  %v1164_v36 = vld [vmem:[%s1439_s5 + $0x8] sm:$0xff]   ;;  %v931_v39 = vld [vmem:[%s1440_s2] ss:$0 sm:$0xff] }
   0xb   :  { %1062 = vmatprep.subr.bf16.mxu1 %v1156_v19  ;;  %1091 = vmatpush3.bf16.msra.mxu0 %v1162_v34 }
   0xc   :  { %1092 = vmatprep.subr.bf16.mxu0 %v1163_v35 }
   0xe   :  { %1047 = vmatmul.mubr.msk.bf16.gmra.mxu0 %vm77_vm1, %v58_v17  ;;  %1063 = vmatpush3.bf16.msra.mxu1 %v1156_v19 }
   0xf   :  { %1050 = vmatprep.mubr.msk.bf16.mxu0 %vm77_vm1, %v59_v18  ;;  %1064 = vmatprep.subr.bf16.mxu1 %v1157_v22 }
  0x10   :  { %1093 = vmatpush3.bf16.msra.mxu0 %v1163_v35  ;;  %v941_v35 = vld [vmem:[%s1442_s4] ss:$0 sm:$0xff] }
  0x11   :  { %1094 = vmatprep.subr.bf16.mxu0 %v1164_v36 }
  0x12   :  { %1065 = vmatpush3.bf16.msra.mxu1 %v1157_v22 }
  0x13   :  { %1066 = vmatprep.subr.bf16.mxu1 %v1158_v27 }
  0x14   :  { %1095 = vmatpush3.bf16.msra.mxu0 %v1164_v36 }
  0x16   :  { %1051 = vmatmul.mubr.msk.bf16.gmra.mxu0 %vm77_vm1, %v60_v25  ;;  %1067 = vmatpush3.bf16.msra.mxu1 %v1158_v27 }
  0x17   :  { %1054 = vmatprep.mubr.msk.bf16.mxu0 %vm77_vm1, %v61_v26  ;;  %1068 = vmatprep.subr.bf16.mxu1 %v1159_v31 }
  0x1a   :  { %1069 = vmatpush3.bf16.msra.mxu1 %v1159_v31  ;;  %v1166_v31 = vld [vmem:[%s1441_s7 + $0x8] sm:$0xff]  }
  0x1b   :  { %1070 = vmatprep.subr.bf16.mxu1 %v1160_v32 }
  0x1e   :  { %1055 = vmatmul.mubr.msk.bf16.gmra.mxu0 %vm77_vm1, %v62_v30  ;;  %1071 = vmatpush3.bf16.msra.mxu1 %v1160_v32  ;;  %v1165_v30 = vld [vmem:[%s1439_s5] sm:$0xff]  }
  0x1f   :  { %1072 = vmatprep.subr.bf16.mxu1 %v1161_v33  ;;  %1096 = vmatprep.subr.bf16.mxu0 %v1165_v30  ;;  %v1167_v32 = vld [vmem:[%s1441_s7] sm:$0xff]  }
  0x20   :  { %1097 = vmatpush3.bf16.msra.mxu0 %v1165_v30 }
  0x22   :  { %1073 = vmatpush3.bf16.msra.mxu1 %v1161_v33 }
  0x23   :  { %1114 = vmatprep.subr.bf16.mxu1 %v1166_v31 }
  0xc6   :  { %v1044_v37 = vpop.f32.mrf.mxu0 }
  0xc7   :  { %v149_v43 = vadd.f32 %v1044_v37, %v931_v39 }
  0xc8   :  { %v140_v38 = vpop.f32.mrf.mxu0 }
  0xc9   :  { %v141_v41 = vadd.f32 %v931_v39, %v140_v38  ;;  %v205_v50 = vmax.f32 %v149_v43, 0.0 }
  0xca   :  { %v1045_v40 = vpop.f32.mrf.mxu0 }
  0xcb   :  { %v152_v42 = vadd.f32 %v1045_v40, %v931_v39  ;;  %v203_v48 = vmax.f32 %v141_v41, 0.0 }
  0xcc   :  { %v143_v44 = vpop.f32.mrf.mxu0 }
  0xcd   :  { %v144_v45 = vadd.f32 %v931_v39, %v143_v44  ;;  %v206_v46 = vmax.f32 %v152_v42, 0.0 }
  0xce   :  { %v1048_v47 = vpop.f32.mrf.mxu0 }
  0xcf   :  { %v204_v49 = vmax.f32 %v144_v45, 0.0  ;;  %v220_v53 = vpack.c.bf16 %v206_v46, %v205_v50  ;;  %v165_v57 = vadd.f32 %v1048_v47, %v931_v39 }
  0xd0   :  { %v156_v51 = vpop.f32.mrf.mxu0 }
  0xd1   :  { %v219_v52 = vpack.c.bf16 %v204_v49, %v203_v48  ;;  %v157_v55 = vadd.f32 %v931_v39, %v156_v51  ;;  %v209_v0 = vmax.f32 %v165_v57, 0.0 }
  0xd2   :  { %v1049_v54 = vpop.f32.mrf.mxu0 }
  0xd3   :  { %v168_v56 = vadd.f32 %v1049_v54, %v931_v39  ;;  %1074 = vmatprep.mubr.bf16.mxu1 %v219_v52  ;;  %v207_v62 = vmax.f32 %v157_v55, 0.0 }
  0xd4   :  { %v159_v58 = vpop.f32.mrf.mxu0  ;;  %1075 = vmatmul.mubr.bf16.vlgmr.msra.gmra.mxu1 %v220_v53 }
  0xd5   :  { %v160_v59 = vadd.f32 %v931_v39, %v159_v58  ;;  %v210_v60 = vmax.f32 %v168_v56, 0.0  ;;  %1115 = vmatpush3.bf16.msra.mxu1 %v1166_v31 }
  0xd6   :  { %v1052_v61 = vpop.f32.mrf.mxu0  ;;  %1116 = vmatprep.subr.bf16.mxu1 %v1167_v32 }
  0xd7   :  { %v208_v63 = vmax.f32 %v160_v59, 0.0  ;;  %v222_v3 = vpack.c.bf16 %v210_v60, %v209_v0  ;;  %v181_v7 = vadd.f32 %v1052_v61, %v931_v39 }
  0xd8   :  { %v172_v1 = vpop.f32.mrf.mxu0 }
  0xd9   :  { %v221_v2 = vpack.c.bf16 %v208_v63, %v207_v62  ;;  %v173_v5 = vadd.f32 %v931_v39, %v172_v1  ;;  %v213_v14 = vmax.f32 %v181_v7, 0.0  ;;  %1117 = vmatpush3.bf16.msra.mxu1 %v1167_v32 }
  0xda   :  { %v1053_v4 = vpop.f32.mrf.mxu0 }
  0xdb   :  { %v184_v6 = vadd.f32 %v1053_v4, %v931_v39  ;;  %1078 = vmatprep.mubr.bf16.mxu1 %v221_v2  ;;  %v211_v12 = vmax.f32 %v173_v5, 0.0 }
  0xdc   :  { %v175_v8 = vpop.f32.mrf.mxu0  ;;  %1079 = vmatmul.mubr.bf16.gmra.mxu1 %v222_v3 }
  0xdd   :  { %v176_v9 = vadd.f32 %v931_v39, %v175_v8  ;;  %v214_v10 = vmax.f32 %v184_v6, 0.0 }
  0xde   :  { %v1056_v11 = vpop.f32.mrf.mxu0 }
  0xdf   :  { %v212_v13 = vmax.f32 %v176_v9, 0.0  ;;  %v224_v17 = vpack.c.bf16 %v214_v10, %v213_v14  ;;  %v197_v21 = vadd.f32 %v1056_v11, %v931_v39 }
  0xe0   :  { %v188_v15 = vpop.f32.mrf.mxu0 }
  0xe1   :  { %v223_v16 = vpack.c.bf16 %v212_v13, %v211_v12  ;;  %v189_v19 = vadd.f32 %v931_v39, %v188_v15  ;;  %v217_v27 = vmax.f32 %v197_v21, 0.0 }
  0xe2   :  { %v1057_v18 = vpop.f32.mrf.mxu0 }
  0xe3   :  { %v200_v20 = vadd.f32 %v1057_v18, %v931_v39  ;;  %1082 = vmatprep.mubr.bf16.mxu1 %v223_v16  ;;  %v215_v25 = vmax.f32 %v189_v19, 0.0 }
  0xe4   :  { %v191_v22 = vpop.f32.mrf.mxu0  ;;  %1083 = vmatmul.mubr.bf16.gmra.mxu1 %v224_v17 }
  0xe5   :  { %v192_v23 = vadd.f32 %v931_v39, %v191_v22  ;;  %v218_v24 = vmax.f32 %v200_v20, 0.0 }
  0xe7   :  { %v216_v26 = vmax.f32 %v192_v23, 0.0  ;;  %v226_v29 = vpack.c.bf16 %v218_v24, %v217_v27 }
  0xe9   :  { %v225_v28 = vpack.c.bf16 %v216_v26, %v215_v25  ;;  %v1168_v26 = vld [vmem:[%s1443_s9] sm:$0xff]  }
  0xea   :  { %1134 = vmatprep.subr.bf16.mxu0 %v1168_v26 }
  0xeb   :  { %1086 = vmatprep.mubr.bf16.mxu1 %v225_v28 }
  0xec   :  { %1087 = vmatmul.mubr.bf16.gmra.mxu1 %v226_v29  ;;  %v950_v29 = vld [vmem:[%s1444_s6] ss:$0 sm:$0xff] }
 0x194   :  { %v1076_v33 = vpop.f32.mrf.mxu1 }
 0x195   :  { %v341_v39 = vadd.f32 %v1076_v33, %v941_v35 }
 0x196   :  { %v332_v34 = vpop.f32.mrf.mxu1 }
 0x197   :  { %v333_v37 = vadd.f32 %v941_v35, %v332_v34  ;;  %v397_v46 = vmax.f32 %v341_v39, 0.0 }
 0x198   :  { %v1077_v36 = vpop.f32.mrf.mxu1 }
 0x199   :  { %v344_v38 = vadd.f32 %v1077_v36, %v941_v35  ;;  %v395_v44 = vmax.f32 %v333_v37, 0.0 }
 0x19a   :  { %v335_v40 = vpop.f32.mrf.mxu1 }
 0x19b   :  { %v336_v41 = vadd.f32 %v941_v35, %v335_v40  ;;  %v398_v42 = vmax.f32 %v344_v38, 0.0 }
 0x19c   :  { %v1080_v43 = vpop.f32.mrf.mxu1 }
 0x19d   :  { %v396_v45 = vmax.f32 %v336_v41, 0.0  ;;  %v412_v49 = vpack.c.bf16 %v398_v42, %v397_v46  ;;  %v357_v53 = vadd.f32 %v1080_v43, %v941_v35 }
 0x19e   :  { %v348_v47 = vpop.f32.mrf.mxu1 }
 0x19f   :  { %v411_v48 = vpack.c.bf16 %v396_v45, %v395_v44  ;;  %v349_v51 = vadd.f32 %v941_v35, %v348_v47  ;;  %v401_v60 = vmax.f32 %v357_v53, 0.0 }
 0x1a0   :  { %v1081_v50 = vpop.f32.mrf.mxu1 }
 0x1a1   :  { %v360_v52 = vadd.f32 %v1081_v50, %v941_v35  ;;  %1098 = vmatprep.mubr.msk.bf16.mxu0 %vm458_vm2, %v411_v48  ;;  %v399_v58 = vmax.f32 %v349_v51, 0.0 }
 0x1a2   :  { %v351_v54 = vpop.f32.mrf.mxu1  ;;  %1099 = vmatmul.mubr.msk.bf16.vlgmr.msra.gmra.mxu0 %vm458_vm2, %v412_v49 }
 0x1a3   :  { %v352_v55 = vadd.f32 %v941_v35, %v351_v54  ;;  %v402_v56 = vmax.f32 %v360_v52, 0.0  ;;  %1135 = vmatpush3.bf16.msra.mxu0 %v1168_v26 }
 0x1a4   :  { %v1084_v57 = vpop.f32.mrf.mxu1 }
 0x1a5   :  { %v400_v59 = vmax.f32 %v352_v55, 0.0  ;;  %v414_v63 = vpack.c.bf16 %v402_v56, %v401_v60  ;;  %v373_v3 = vadd.f32 %v1084_v57, %v941_v35 }
 0x1a6   :  { %v364_v61 = vpop.f32.mrf.mxu1 }
 0x1a7   :  { %v413_v62 = vpack.c.bf16 %v400_v59, %v399_v58  ;;  %v365_v1 = vadd.f32 %v941_v35, %v364_v61  ;;  %v405_v10 = vmax.f32 %v373_v3, 0.0 }
 0x1a8   :  { %v1085_v0 = vpop.f32.mrf.mxu1 }
 0x1a9   :  { %v376_v2 = vadd.f32 %v1085_v0, %v941_v35  ;;  %1102 = vmatprep.mubr.msk.bf16.mxu0 %vm458_vm2, %v413_v62  ;;  %v403_v8 = vmax.f32 %v365_v1, 0.0 }
 0x1aa   :  { %v367_v4 = vpop.f32.mrf.mxu1  ;;  %1103 = vmatmul.mubr.msk.bf16.gmra.mxu0 %vm458_vm2, %v414_v63 }
 0x1ab   :  { %v368_v5 = vadd.f32 %v941_v35, %v367_v4  ;;  %v406_v6 = vmax.f32 %v376_v2, 0.0 }
 0x1ac   :  { %v1088_v7 = vpop.f32.mrf.mxu1 }
 0x1ad   :  { %v404_v9 = vmax.f32 %v368_v5, 0.0  ;;  %v416_v13 = vpack.c.bf16 %v406_v6, %v405_v10  ;;  %v389_v17 = vadd.f32 %v1088_v7, %v941_v35 }
 0x1ae   :  { %v380_v11 = vpop.f32.mrf.mxu1 }
 0x1af   :  { %v415_v12 = vpack.c.bf16 %v404_v9, %v403_v8  ;;  %v381_v15 = vadd.f32 %v941_v35, %v380_v11  ;;  %v409_v23 = vmax.f32 %v389_v17, 0.0 }
 0x1b0   :  { %v1089_v14 = vpop.f32.mrf.mxu1 }
 0x1b1   :  { %v392_v16 = vadd.f32 %v1089_v14, %v941_v35  ;;  %1106 = vmatprep.mubr.msk.bf16.mxu0 %vm458_vm2, %v415_v12  ;;  %v407_v21 = vmax.f32 %v381_v15, 0.0 }
 0x1b2   :  { %v383_v18 = vpop.f32.mrf.mxu1  ;;  %1107 = vmatmul.mubr.msk.bf16.gmra.mxu0 %vm458_vm2, %v416_v13 }
 0x1b3   :  { %v384_v19 = vadd.f32 %v941_v35, %v383_v18  ;;  %v410_v20 = vmax.f32 %v392_v16, 0.0 }
 0x1b5   :  { %v408_v22 = vmax.f32 %v384_v19, 0.0  ;;  %v418_v25 = vpack.c.bf16 %v410_v20, %v409_v23 }
 0x1b7   :  { %v417_v24 = vpack.c.bf16 %v408_v22, %v407_v21  ;;  %v963_v22 = vld [vmem:[%s1445_s8] ss:$0 sm:$0xff] }
 0x1b9   :  { %1110 = vmatprep.mubr.msk.bf16.mxu0 %vm458_vm2, %v417_v24 }
 0x1ba   :  { %1111 = vmatmul.mubr.msk.bf16.gmra.mxu0 %vm458_vm2, %v418_v25 }
 0x262   :  { %v1100_v27 = vpop.f32.mrf.mxu0 }
 0x263   :  { %v526_v33 = vadd.f32 %v1100_v27, %v950_v29 }
 0x264   :  { %v517_v28 = vpop.f32.mrf.mxu0 }
 0x265   :  { %v518_v31 = vadd.f32 %v950_v29, %v517_v28  ;;  %v582_v40 = vmax.f32 %v526_v33, 0.0 }
 0x266   :  { %v1101_v30 = vpop.f32.mrf.mxu0 }
 0x267   :  { %v529_v32 = vadd.f32 %v1101_v30, %v950_v29  ;;  %v580_v38 = vmax.f32 %v518_v31, 0.0 }
 0x268   :  { %v520_v34 = vpop.f32.mrf.mxu0 }
 0x269   :  { %v521_v35 = vadd.f32 %v950_v29, %v520_v34  ;;  %v583_v36 = vmax.f32 %v529_v32, 0.0 }
 0x26a   :  { %v1104_v37 = vpop.f32.mrf.mxu0 }
 0x26b   :  { %v581_v39 = vmax.f32 %v521_v35, 0.0  ;;  %v597_v43 = vpack.c.bf16 %v583_v36, %v582_v40  ;;  %v542_v47 = vadd.f32 %v1104_v37, %v950_v29 }
 0x26c   :  { %v533_v41 = vpop.f32.mrf.mxu0 }
 0x26d   :  { %v596_v42 = vpack.c.bf16 %v581_v39, %v580_v38  ;;  %v534_v45 = vadd.f32 %v950_v29, %v533_v41  ;;  %v586_v54 = vmax.f32 %v542_v47, 0.0 }
 0x26e   :  { %v1105_v44 = vpop.f32.mrf.mxu0 }
 0x26f   :  { %v545_v46 = vadd.f32 %v1105_v44, %v950_v29  ;;  %1118 = vmatprep.mubr.msk.bf16.mxu1 %vm627_vm3, %v596_v42  ;;  %v584_v52 = vmax.f32 %v534_v45, 0.0 }
 0x270   :  { %v536_v48 = vpop.f32.mrf.mxu0  ;;  %1119 = vmatmul.mubr.msk.bf16.vlgmr.msra.gmra.mxu1 %vm627_vm3, %v597_v43 }
 0x271   :  { %v537_v49 = vadd.f32 %v950_v29, %v536_v48  ;;  %v587_v50 = vmax.f32 %v545_v46, 0.0 }
 0x272   :  { %v1108_v51 = vpop.f32.mrf.mxu0 }
 0x273   :  { %v585_v53 = vmax.f32 %v537_v49, 0.0  ;;  %v599_v57 = vpack.c.bf16 %v587_v50, %v586_v54  ;;  %v558_v61 = vadd.f32 %v1108_v51, %v950_v29 }
 0x274   :  { %v549_v55 = vpop.f32.mrf.mxu0 }
 0x275   :  { %v598_v56 = vpack.c.bf16 %v585_v53, %v584_v52  ;;  %v550_v59 = vadd.f32 %v950_v29, %v549_v55  ;;  %v590_v4 = vmax.f32 %v558_v61, 0.0 }
 0x276   :  { %v1109_v58 = vpop.f32.mrf.mxu0 }
 0x277   :  { %v561_v60 = vadd.f32 %v1109_v58, %v950_v29  ;;  %1122 = vmatprep.mubr.msk.bf16.mxu1 %vm627_vm3, %v598_v56  ;;  %v588_v2 = vmax.f32 %v550_v59, 0.0 }
 0x278   :  { %v552_v62 = vpop.f32.mrf.mxu0  ;;  %1123 = vmatmul.mubr.msk.bf16.gmra.mxu1 %vm627_vm3, %v599_v57 }
 0x279   :  { %v553_v63 = vadd.f32 %v950_v29, %v552_v62  ;;  %v591_v0 = vmax.f32 %v561_v60, 0.0 }
 0x27a   :  { %v1112_v1 = vpop.f32.mrf.mxu0 }
 0x27b   :  { %v589_v3 = vmax.f32 %v553_v63, 0.0  ;;  %v601_v7 = vpack.c.bf16 %v591_v0, %v590_v4  ;;  %v574_v11 = vadd.f32 %v1112_v1, %v950_v29 }
 0x27c   :  { %v565_v5 = vpop.f32.mrf.mxu0 }
 0x27d   :  { %v600_v6 = vpack.c.bf16 %v589_v3, %v588_v2  ;;  %v566_v9 = vadd.f32 %v950_v29, %v565_v5  ;;  %v594_v17 = vmax.f32 %v574_v11, 0.0 }
 0x27e   :  { %v1113_v8 = vpop.f32.mrf.mxu0 }
 0x27f   :  { %v577_v10 = vadd.f32 %v1113_v8, %v950_v29  ;;  %1126 = vmatprep.mubr.msk.bf16.mxu1 %vm627_vm3, %v600_v6  ;;  %v592_v15 = vmax.f32 %v566_v9, 0.0 }
 0x280   :  { %v568_v12 = vpop.f32.mrf.mxu0  ;;  %1127 = vmatmul.mubr.msk.bf16.gmra.mxu1 %vm627_vm3, %v601_v7 }
 0x281   :  { %v569_v13 = vadd.f32 %v950_v29, %v568_v12  ;;  %v595_v14 = vmax.f32 %v577_v10, 0.0 }
 0x283   :  { %v593_v16 = vmax.f32 %v569_v13, 0.0  ;;  %v603_v19 = vpack.c.bf16 %v595_v14, %v594_v17  ;;  %v974_v13 = vld [vmem:[%s1446_s10] ss:$0 sm:$0xff] }
 0x285   :  { %v602_v18 = vpack.c.bf16 %v593_v16, %v592_v15 }
 0x287   :  { %1130 = vmatprep.mubr.msk.bf16.mxu1 %vm627_vm3, %v602_v18 }
 0x288   :  { %1131 = vmatmul.mubr.msk.bf16.gmra.mxu1 %vm627_vm3, %v603_v19 }
 0x330   :  { %v1120_v20 = vpop.f32.mrf.mxu1 }
 0x331   :  { %v695_v26 = vadd.f32 %v1120_v20, %v963_v22 }
 0x332   :  { %v686_v21 = vpop.f32.mrf.mxu1 }
 0x333   :  { %v687_v24 = vadd.f32 %v963_v22, %v686_v21  ;;  %v751_v33 = vmax.f32 %v695_v26, 0.0 }
 0x334   :  { %v1121_v23 = vpop.f32.mrf.mxu1 }
 0x335   :  { %v698_v25 = vadd.f32 %v1121_v23, %v963_v22  ;;  %v749_v31 = vmax.f32 %v687_v24, 0.0 }
 0x336   :  { %v689_v27 = vpop.f32.mrf.mxu1 }
 0x337   :  { %v690_v28 = vadd.f32 %v963_v22, %v689_v27  ;;  %v752_v29 = vmax.f32 %v698_v25, 0.0 }
 0x338   :  { %v1124_v30 = vpop.f32.mrf.mxu1 }
 0x339   :  { %v750_v32 = vmax.f32 %v690_v28, 0.0  ;;  %v766_v36 = vpack.c.bf16 %v752_v29, %v751_v33  ;;  %v711_v40 = vadd.f32 %v1124_v30, %v963_v22 }
 0x33a   :  { %v702_v34 = vpop.f32.mrf.mxu1 }
 0x33b   :  { %v765_v35 = vpack.c.bf16 %v750_v32, %v749_v31  ;;  %v703_v38 = vadd.f32 %v963_v22, %v702_v34  ;;  %v755_v47 = vmax.f32 %v711_v40, 0.0 }
 0x33c   :  { %v1125_v37 = vpop.f32.mrf.mxu1 }
 0x33d   :  { %v714_v39 = vadd.f32 %v1125_v37, %v963_v22  ;;  %1136 = vmatprep.mubr.msk.bf16.mxu0 %vm788_vm4, %v765_v35  ;;  %v753_v45 = vmax.f32 %v703_v38, 0.0 }
 0x33e   :  { %v705_v41 = vpop.f32.mrf.mxu1  ;;  %1137 = vmatmul.mubr.msk.bf16.vlgmr.msra.gmra.mxu0 %vm788_vm4, %v766_v36 }
 0x33f   :  { %v706_v42 = vadd.f32 %v963_v22, %v705_v41  ;;  %v756_v43 = vmax.f32 %v714_v39, 0.0 }
 0x340   :  { %v1128_v44 = vpop.f32.mrf.mxu1 }
 0x341   :  { %v754_v46 = vmax.f32 %v706_v42, 0.0  ;;  %v768_v50 = vpack.c.bf16 %v756_v43, %v755_v47  ;;  %v727_v54 = vadd.f32 %v1128_v44, %v963_v22 }
 0x342   :  { %v718_v48 = vpop.f32.mrf.mxu1 }
 0x343   :  { %v767_v49 = vpack.c.bf16 %v754_v46, %v753_v45  ;;  %v719_v52 = vadd.f32 %v963_v22, %v718_v48  ;;  %v759_v61 = vmax.f32 %v727_v54, 0.0 }
 0x344   :  { %v1129_v51 = vpop.f32.mrf.mxu1 }
 0x345   :  { %v730_v53 = vadd.f32 %v1129_v51, %v963_v22  ;;  %1140 = vmatprep.mubr.msk.bf16.mxu0 %vm788_vm4, %v767_v49  ;;  %v757_v59 = vmax.f32 %v719_v52, 0.0 }
 0x346   :  { %v721_v55 = vpop.f32.mrf.mxu1  ;;  %1141 = vmatmul.mubr.msk.bf16.gmra.mxu0 %vm788_vm4, %v768_v50 }
 0x347   :  { %v722_v56 = vadd.f32 %v963_v22, %v721_v55  ;;  %v760_v57 = vmax.f32 %v730_v53, 0.0 }
 0x348   :  { %v1132_v58 = vpop.f32.mrf.mxu1 }
 0x349   :  { %v758_v60 = vmax.f32 %v722_v56, 0.0  ;;  %v770_v0 = vpack.c.bf16 %v760_v57, %v759_v61  ;;  %v743_v4 = vadd.f32 %v1132_v58, %v963_v22 }
 0x34a   :  { %v734_v62 = vpop.f32.mrf.mxu1 }
 0x34b   :  { %v769_v63 = vpack.c.bf16 %v758_v60, %v757_v59  ;;  %v735_v2 = vadd.f32 %v963_v22, %v734_v62  ;;  %v763_v10 = vmax.f32 %v743_v4, 0.0 }
 0x34c   :  { %v1133_v1 = vpop.f32.mrf.mxu1 }
 0x34d   :  { %v746_v3 = vadd.f32 %v1133_v1, %v963_v22  ;;  %1144 = vmatprep.mubr.msk.bf16.mxu0 %vm788_vm4, %v769_v63  ;;  %v761_v8 = vmax.f32 %v735_v2, 0.0 }
 0x34e   :  { %v737_v5 = vpop.f32.mrf.mxu1  ;;  %1145 = vmatmul.mubr.msk.bf16.gmra.mxu0 %vm788_vm4, %v770_v0 }
 0x34f   :  { %v738_v6 = vadd.f32 %v963_v22, %v737_v5  ;;  %v764_v7 = vmax.f32 %v746_v3, 0.0 }
 0x351   :  { %v762_v9 = vmax.f32 %v738_v6, 0.0  ;;  %v772_v12 = vpack.c.bf16 %v764_v7, %v763_v10 }
 0x353   :  { %v771_v11 = vpack.c.bf16 %v762_v9, %v761_v8 }
 0x355   :  { %1148 = vmatprep.mubr.msk.bf16.mxu0 %vm788_vm4, %v771_v11 }
 0x356   :  { %1149 = vmatmul.mubr.msk.bf16.gmra.mxu0 %vm788_vm4, %v772_v12 }
 0x3fe   :  { %v1138_v14 = vpop.f32.mrf.mxu0 }
 0x3ff   :  { %v856_v15 = vadd.f32 %v1138_v14, %v974_v13 }
 0x400   :  { %v847_v16 = vpop.f32.mrf.mxu0 }
 0x401   :  { %913 = vst.msk [vmem:[%s1447_s11 + $0x10] sm:$0xff] %vm910_vm5, %v856_v15  ;;  %v848_v17 = vadd.f32 %v974_v13, %v847_v16 }
 0x402   :  { %v1139_v18 = vpop.f32.mrf.mxu0 }
 0x403   :  { %911 = vst.msk [vmem:[%s1447_s11] sm:$0xff] %vm910_vm5, %v848_v17  ;;  %v859_v19 = vadd.f32 %v1139_v18, %v974_v13 }
 0x404   :  { %v850_v20 = vpop.f32.mrf.mxu0 }
 0x405   :  { %914 = vst.msk [vmem:[%s1447_s11 + $0x18] sm:$0xff] %vm910_vm5, %v859_v19  ;;  %v851_v21 = vadd.f32 %v974_v13, %v850_v20 }
 0x406   :  { %v1142_v22 = vpop.f32.mrf.mxu0 }
 0x407   :  { %912 = vst.msk [vmem:[%s1447_s11 + $0x8] sm:$0xff] %vm910_vm5, %v851_v21  ;;  %v872_v23 = vadd.f32 %v1142_v22, %v974_v13 }
 0x408   :  { %v863_v24 = vpop.f32.mrf.mxu0 }
 0x409   :  { %917 = vst.msk [vmem:[%s1447_s11 + $0x30] sm:$0xff] %vm910_vm5, %v872_v23  ;;  %v864_v25 = vadd.f32 %v974_v13, %v863_v24 }
 0x40a   :  { %v1143_v26 = vpop.f32.mrf.mxu0 }
 0x40b   :  { %915 = vst.msk [vmem:[%s1447_s11 + $0x20] sm:$0xff] %vm910_vm5, %v864_v25  ;;  %v875_v27 = vadd.f32 %v1143_v26, %v974_v13 }
 0x40c   :  { %v866_v28 = vpop.f32.mrf.mxu0 }
 0x40d   :  { %918 = vst.msk [vmem:[%s1447_s11 + $0x38] sm:$0xff] %vm910_vm5, %v875_v27  ;;  %v867_v29 = vadd.f32 %v974_v13, %v866_v28 }
 0x40e   :  { %v1146_v30 = vpop.f32.mrf.mxu0 }
 0x40f   :  { %916 = vst.msk [vmem:[%s1447_s11 + $0x28] sm:$0xff] %vm910_vm5, %v867_v29  ;;  %v888_v31 = vadd.f32 %v1146_v30, %v974_v13 }
 0x410   :  { %v879_v32 = vpop.f32.mrf.mxu0 }
 0x411   :  { %921 = vst.msk [vmem:[%s1447_s11 + $0x50] sm:$0xff] %vm910_vm5, %v888_v31  ;;  %v880_v33 = vadd.f32 %v974_v13, %v879_v32 }
 0x412   :  { %v1147_v34 = vpop.f32.mrf.mxu0 }
 0x413   :  { %919 = vst.msk [vmem:[%s1447_s11 + $0x40] sm:$0xff] %vm910_vm5, %v880_v33  ;;  %v891_v35 = vadd.f32 %v1147_v34, %v974_v13 }
 0x414   :  { %v882_v36 = vpop.f32.mrf.mxu0 }
 0x415   :  { %922 = vst.msk [vmem:[%s1447_s11 + $0x58] sm:$0xff] %vm910_vm5, %v891_v35  ;;  %v883_v37 = vadd.f32 %v974_v13, %v882_v36 }
 0x416   :  { %v1150_v38 = vpop.f32.mrf.mxu0 }
 0x417   :  { %920 = vst.msk [vmem:[%s1447_s11 + $0x48] sm:$0xff] %vm910_vm5, %v883_v37  ;;  %v904_v39 = vadd.f32 %v1150_v38, %v974_v13 }
 0x418   :  { %v895_v40 = vpop.f32.mrf.mxu0 }
 0x419   :  { %925 = vst.msk [vmem:[%s1447_s11 + $0x70] sm:$0xff] %vm910_vm5, %v904_v39  ;;  %v896_v41 = vadd.f32 %v974_v13, %v895_v40 }
 0x41a   :  { %v1151_v42 = vpop.f32.mrf.mxu0 }
 0x41b   :  { %923 = vst.msk [vmem:[%s1447_s11 + $0x60] sm:$0xff] %vm910_vm5, %v896_v41  ;;  %v907_v43 = vadd.f32 %v1151_v42, %v974_v13 }
 0x41c   :  { %v898_v44 = vpop.f32.mrf.mxu0 }
 0x41d   :  { %926 = vst.msk [vmem:[%s1447_s11 + $0x78] sm:$0xff] %vm910_vm5, %v907_v43  ;;  %v899_v45 = vadd.f32 %v974_v13, %v898_v44 }
 0x41f   :  { %924 = vst.msk [vmem:[%s1447_s11 + $0x68] sm:$0xff] %vm910_vm5, %v899_v45 }

</bundles_post_ra>
